<compile_context>
chip_gen: v6e
topology: v6e:2x2x1
jax: 0.10.0
libtpu: 0.0.40
codegen_flags: <defaults>
</compile_context>

<pallas_src>
import jax
import jax.numpy as jnp
from jax.experimental import pallas as pl
from jax.experimental.pallas import tpu as pltpu


def _ffn_kernel(x_ref, w1_ref, b1_ref, w2_ref, b2_ref, o_ref):
    # x_ref block: (TM, dim); weights / biases are fully resident in VMEM.
    x = x_ref[...]
    # Operands stay f32 so numerics match the f32 PyTorch module on every TPU
    # generation (v5e has no bf16 VPU path). On v6e/v7x, casting x/w to bfloat16
    # while keeping preferred_element_type=f32 is an optional further speedup.
    h = jnp.dot(x, w1_ref[...], preferred_element_type=jnp.float32) + b1_ref[...]
    h = jnp.maximum(h, 0.0)                       # ReLU (Dropout p=0.0 -> identity)
    y = jnp.dot(h, w2_ref[...], preferred_element_type=jnp.float32) + b2_ref[...]
    o_ref[...] = y.astype(o_ref.dtype)


def _unit_net_batched(x_all, w1, b1, w2, b2):
    """Apply the shared MLP to a flat (M, dim) token matrix with one pallas_call."""
    M, dim = x_all.shape
    hidden = w1.shape[1]

    # Prefer 2 row blocks (keeps both v7x TensorCores busy). A block's row count must
    # be a multiple of 8 (sublane tiling) unless it equals the full extent.
    n_blocks = 2 if (M % 16 == 0) else 1
    tm = M // n_blocks

    return pl.pallas_call(
        _ffn_kernel,
        out_shape=jax.ShapeDtypeStruct((M, dim), x_all.dtype),
        grid_spec=pltpu.PrefetchScalarGridSpec(
            num_scalar_prefetch=0,
            grid=(n_blocks,),
            in_specs=[
                pl.BlockSpec((tm, dim), lambda i: (i, 0)),       # tokens
                pl.BlockSpec((dim, hidden), lambda i: (0, 0)),   # W1 (in, out) layout
                pl.BlockSpec((1, hidden), lambda i: (0, 0)),     # b1
                pl.BlockSpec((hidden, dim), lambda i: (0, 0)),   # W2 (in, out) layout
                pl.BlockSpec((1, dim), lambda i: (0, 0)),        # b2
            ],
            out_specs=pl.BlockSpec((tm, dim), lambda i: (i, 0)),
        ),
        compiler_params=pltpu.CompilerParams(
            dimension_semantics=("parallel",),
        ),
    )(x_all, w1, b1, w2, b2)


def feedforward_fa_forward(x, x_delta, x_theta, x_alpha, x_beta, x_gamma, x_upper,
                           w1, b1, w2, b2, w_gate, *, num_experts=6):
    """Forward of FeedForward_FA (dropout=0). Returns the same 9-tuple as PyTorch:
    (x_out, delta, theta, alpha, beta, gamma, upper, L1, w_gate)."""
    streams = (x, x_delta, x_theta, x_alpha, x_beta, x_gamma, x_upper)
    B, N, dim = x.shape
    n_streams = len(streams)

    # One flat token matrix for all 7 streams -> one pair of big MXU matmuls.
    x_all = jnp.stack(streams, axis=0).reshape(n_streams * B * N, dim)
    y_all = _unit_net_batched(x_all, w1, b1, w2, b2)
    y_all = y_all.reshape(n_streams, B, N, dim)

    y_x, delta, theta, alpha, beta, gamma, upper = (y_all[i] for i in range(n_streams))

    # All experts alias the same unit_net, so stack([unit_net(x)]*6) weighted by
    # softmax(w_gate) and summed over the expert axis == unit_net(x) * sum(softmax).
    gate = jax.nn.softmax(w_gate, axis=0)          # nn.Softmax(dim=0)
    x_out = y_x * jnp.sum(gate)
    l1 = jnp.sum(jnp.abs(w_gate))                  # w_gate.norm(1)

    # TODO(synk): nn.Dropout layers are identity at p=0.0; no stochastic path implemented.
    return (x_out, delta, theta, alpha, beta, gamma, upper, l1, w_gate)


def _reference_forward(x, x_delta, x_theta, x_alpha, x_beta, x_gamma, x_upper,
                       w1, b1, w2, b2, w_gate, *, num_experts=6):
    """Pure-JAX literal translation of the PyTorch module (dropout=0)."""
    def unit_net(t):
        h = jnp.maximum(t @ w1 + b1, 0.0)
        return h @ w2 + b2

    delta = unit_net(x_delta)
    theta = unit_net(x_theta)
    alpha = unit_net(x_alpha)
    beta = unit_net(x_beta)
    gamma = unit_net(x_gamma)
    upper = unit_net(x_upper)
    expert_outputs = jnp.stack([unit_net(x) for _ in range(num_experts)], axis=3)
    gate = jax.nn.softmax(w_gate, axis=0)
    x_out = jnp.sum(gate * expert_outputs, axis=3)
    l1 = jnp.sum(jnp.abs(w_gate))
    return (x_out, delta, theta, alpha, beta, gamma, upper, l1, w_gate)


if __name__ == "__main__":
    # Small shapes consistent with the module's "b n c" usage; dim/hidden chosen as
    # multiples of 128 so all Pallas loads/stores are lane-dense.
    dim = 128
    hidden_dim = 256
    num_experts = 6
    B, N = 2, 8

    key = jax.random.PRNGKey(0)
    keys = jax.random.split(key, 5 + 7)
    k_w1, k_b1, k_w2, k_b2, k_gate = keys[:5]
    k_xs = keys[5:]

    # PyTorch Linear stores weight as (out, in) and computes x @ W.T + b;
    # here weights are stored pre-transposed in (in, out) layout.
    w1 = jax.random.normal(k_w1, (dim, hidden_dim), jnp.float32) * 0.05
    b1 = jax.random.normal(k_b1, (1, hidden_dim), jnp.float32) * 0.05
    w2 = jax.random.normal(k_w2, (hidden_dim, dim), jnp.float32) * 0.05
    b2 = jax.random.normal(k_b2, (1, dim), jnp.float32) * 0.05
    w_gate = jax.random.normal(k_gate, (num_experts,), jnp.float32)

    # 7 input streams: x, x_delta, x_theta, x_alpha, x_beta, x_gamma, x_upper
    x, x_delta, x_theta, x_alpha, x_beta, x_gamma, x_upper = (
        jax.random.normal(k, (B, N, dim), jnp.float32) for k in k_xs)

    outs = feedforward_fa_forward(
        x, x_delta, x_theta, x_alpha, x_beta, x_gamma, x_upper,
        w1, b1, w2, b2, w_gate, num_experts=num_experts)
    outs = jax.block_until_ready(outs)

    refs = _reference_forward(
        x, x_delta, x_theta, x_alpha, x_beta, x_gamma, x_upper,
        w1, b1, w2, b2, w_gate, num_experts=num_experts)

    # First 7 outputs are (B, N, dim) tensors; then scalar L1 and w_gate passthrough.
    for i in range(7):
        assert outs[i].shape == (B, N, dim)
    assert outs[7].shape == ()
    assert outs[8].shape == (num_experts,)
    for o, r in zip(outs, refs):
        assert jnp.allclose(o, r, atol=1e-3, rtol=1e-3), "mismatch vs reference"

    print("KERNEL_OK")
</pallas_src>

<mosaic_0001>
module attributes {stable_mosaic.version = 11 : i64} {
  func.func @_ffn_kernel(%arg0: i32, %arg1: memref<56x128xf32, #tpu.memory_space<vmem>>, %arg2: memref<128x256xf32, #tpu.memory_space<vmem>>, %arg3: memref<1x256xf32, #tpu.memory_space<vmem>>, %arg4: memref<256x128xf32, #tpu.memory_space<vmem>>, %arg5: memref<1x128xf32, #tpu.memory_space<vmem>>, %arg6: memref<56x128xf32, #tpu.memory_space<vmem>>) attributes {dimension_semantics = [#tpu.dimension_semantics<parallel>], iteration_bounds = array<i64: 2>, scalar_prefetch = 0 : i64, scratch_operands = 0 : i64, tpu.core_type = #tpu.core_type<tc>, window_params = [{transform_indices = @transform_0, window_bounds = array<i64: 56, 128>}, {pipeline_mode = #tpu.pipeline_mode<synchronous>, transform_indices = @transform_1, window_bounds = array<i64: 128, 256>}, {pipeline_mode = #tpu.pipeline_mode<synchronous>, transform_indices = @transform_2, window_bounds = array<i64: 1, 256>}, {pipeline_mode = #tpu.pipeline_mode<synchronous>, transform_indices = @transform_3, window_bounds = array<i64: 256, 128>}, {pipeline_mode = #tpu.pipeline_mode<synchronous>, transform_indices = @transform_4, window_bounds = array<i64: 1, 128>}, {transform_indices = @transform_5, window_bounds = array<i64: 56, 128>}]} {
    %c0 = arith.constant 0 : index
    %c0_0 = arith.constant 0 : index
    %0 = vector.load %arg1[%c0, %c0_0] : memref<56x128xf32, #tpu.memory_space<vmem>>, vector<56x128xf32>
    %c0_1 = arith.constant 0 : index
    %c0_2 = arith.constant 0 : index
    %1 = vector.load %arg2[%c0_1, %c0_2] : memref<128x256xf32, #tpu.memory_space<vmem>>, vector<128x256xf32>
    %cst = arith.constant dense<0.000000e+00> : vector<56x256xf32>
    %2 = tpu.matmul %0, %1, %cst {dimension_numbers = #tpu.dot_dimension_numbers<[1], [0], [0], [1], [0, 0, 1, 1], [], []>} : vector<56x128xf32>, vector<128x256xf32>, vector<56x256xf32> -> vector<56x256xf32>
    %c0_3 = arith.constant 0 : index
    %c0_4 = arith.constant 0 : index
    %3 = vector.load %arg3[%c0_3, %c0_4] : memref<1x256xf32, #tpu.memory_space<vmem>>, vector<1x256xf32>
    %4 = vector.broadcast %3 : vector<1x256xf32> to vector<56x256xf32>
    %5 = arith.addf %2, %4 : vector<56x256xf32>
    %cst_5 = arith.constant 0.000000e+00 : f32
    %6 = vector.broadcast %cst_5 : f32 to vector<56x256xf32>
    %7 = arith.maximumf %5, %6 : vector<56x256xf32>
    %c0_6 = arith.constant 0 : index
    %c0_7 = arith.constant 0 : index
    %8 = vector.load %arg4[%c0_6, %c0_7] : memref<256x128xf32, #tpu.memory_space<vmem>>, vector<256x128xf32>
    %cst_8 = arith.constant dense<0.000000e+00> : vector<56x128xf32>
    %9 = tpu.matmul %7, %8, %cst_8 {dimension_numbers = #tpu.dot_dimension_numbers<[1], [0], [0], [1], [0, 0, 1, 1], [], []>} : vector<56x256xf32>, vector<256x128xf32>, vector<56x128xf32> -> vector<56x128xf32>
    %c0_9 = arith.constant 0 : index
    %c0_10 = arith.constant 0 : index
    %10 = vector.load %arg5[%c0_9, %c0_10] : memref<1x128xf32, #tpu.memory_space<vmem>>, vector<1x128xf32>
    %11 = vector.broadcast %10 : vector<1x128xf32> to vector<56x128xf32>
    %12 = arith.addf %9, %11 : vector<56x128xf32>
    %c0_11 = arith.constant 0 : index
    %c0_12 = arith.constant 0 : index
    %13 = vector.load %arg6[%c0_11, %c0_12] : memref<56x128xf32, #tpu.memory_space<vmem>>, vector<56x128xf32>
    tpu.vector_store %arg6[%c0_11, %c0_12], %12 {strides = array<i32>} : memref<56x128xf32, #tpu.memory_space<vmem>>, vector<56x128xf32>,
    return
  }
  func.func @transform_0(%arg0: i32) -> (i32, i32) {
    %c0_i32 = arith.constant 0 : i32
    %c0_i32_0 = arith.constant 0 : i32
    return %arg0, %c0_i32 : i32, i32
  }
  func.func @transform_1(%arg0: i32) -> (i32, i32) {
    %c0_i32 = arith.constant 0 : i32
    %c0_i32_0 = arith.constant 0 : i32
    %c0_i32_1 = arith.constant 0 : i32
    return %c0_i32, %c0_i32_0 : i32, i32
  }
  func.func @transform_2(%arg0: i32) -> (i32, i32) {
    %c0_i32 = arith.constant 0 : i32
    %c0_i32_0 = arith.constant 0 : i32
    %c0_i32_1 = arith.constant 0 : i32
    return %c0_i32, %c0_i32_0 : i32, i32
  }
  func.func @transform_3(%arg0: i32) -> (i32, i32) {
    %c0_i32 = arith.constant 0 : i32
    %c0_i32_0 = arith.constant 0 : i32
    %c0_i32_1 = arith.constant 0 : i32
    return %c0_i32, %c0_i32_0 : i32, i32
  }
  func.func @transform_4(%arg0: i32) -> (i32, i32) {
    %c0_i32 = arith.constant 0 : i32
    %c0_i32_0 = arith.constant 0 : i32
    %c0_i32_1 = arith.constant 0 : i32
    return %c0_i32, %c0_i32_0 : i32, i32
  }
  func.func @transform_5(%arg0: i32) -> (i32, i32) {
    %c0_i32 = arith.constant 0 : i32
    %c0_i32_0 = arith.constant 0 : i32
    return %arg0, %c0_i32 : i32, i32
  }
}

</mosaic_0001>

<bundles_post_ra>
// kernel: tpu_custom_call.1
= control target key start
LH: loop header
LB: loop body
LE: loop exit
PB: predicated region body
PF: predicated region fallthrough
CT: control target
= control target key end

     0   :  { %10 = vsyncpa [#allocation3], 0  ;;  %s1263_s0 = inlined_call_operand.hbm [shape: f32[112,128], index: 0, kind: input, shape index: {}]   ;;  %s1264_s1 = inlined_call_operand.hbm [shape: f32[128,256], index: 1, kind: input, shape index: {}]   ;;  %s1265_s2 = inlined_call_operand.vmem [shape: f32[1,256], index: 2, kind: input, shape index: {}]   ;;  %s1266_s3 = inlined_call_operand.hbm [shape: f32[256,128], index: 3, kind: input, shape index: {}]   ;;  %s1267_s4 = inlined_call_operand.vmem [shape: f32[1,128], index: 4, kind: input, shape index: {}]   ;;  %s1268_s5 = inlined_call_operand.hbm [shape: f32[112,128], index: 5, kind: output, shape index: {}]  }
   0x1   :  { %12 = vsyncpa [#allocation3 + $0x1], 0 }
   0x2   :  { %13 = vsyncpa [#allocation6], 0 }
   0x3   :  { %14 = vsyncpa [#allocation4], 0 }
   0x4   :  { %16 = vsyncpa [#allocation4 + $0x1], 0  ;;  %s1033_s18 = smov 0   ;;  %s1035_s19 = smov 0  }
   0x5   :  { %s1037_s20 = smov 0   ;;  %s1039_s21 = smov 0  }
   0x6 LB: > { %s1054_s22 = sadd.s32 4294967295, %s990_s21   ;;  %s698_s23 = sadd.s32 4294967294, %s990_s21   ;;  %s990_s21 = sphi %s1039_s21, %s1292_s21   ;;  %s986_s20 = sphi %s1037_s20, %s1291_s20   ;;  %s982_s19 = sphi %s1035_s19, %s1290_s19   ;;  %s978_s18 = sphi %s1033_s18, %s1289_s18  }
   0x7   : > { %p42_p0 = scmp.ne.s32.totalorder %s982_s19, %s978_s18  ;;  %p1269_p1 = scmp.eq.s32.totalorder %s1054_s22, 0 }
   0x8   : > { %p156_p3 = scmp.eq.s32.totalorder %s698_s23, 1  ;;  %p699_p5 = scmp.ge.s32.totalorder %s990_s21, 1 }
   0x9   : > { %p1063_p4 = por %p1269_p1, %p42_p0  ;;  %p163_p7 = scmp.lt.s32.totalorder %s990_s21, 3 }
   0xa   : > { %p1068_p6 = por %p156_p3, %p42_p0  ;;  %s992_s27 = smov [#allocation5]  }
   0xb   : > { %s1274_s24 = scalar_select %p1063_p4, 1, 0 }
   0xc   : > { %s1275_s25 = scalar_select %p1068_p6, 1, 0 }
   0xd   : > { %p1073_p8 = pnand %p699_p5, %p163_p7  ;;  %s175_s28 = sshll.u32 %s992_s27, 4  ;;  %s176_s28 = int_to_ptr.vmem [resolvable:$true] %s175_s28 }
   0xe   : > { %s993_s30 = smov [#allocation7]   ;;  %s853_s7 = scalar_lea.vmem %s176_s28, 4096 }
   0xf   : > { %s1276_s26 = scalar_select %p1073_p8, 1, 0 }
  0x10   : > { %p780_p9 = pneg %p1073_p8  ;;  %s191_s6 = sshll.u32 %s993_s30, 4  ;;  %s192_s6 = int_to_ptr.vmem [resolvable:$true] %s191_s6 }
  0x11   : > { %p854_p13 = scmp.ne.s32.totalorder %s176_s28, %s853_s7  ;;  %p861_p5 = scmp.lt.s32.totalorder %s176_s28, %s176_s28 }
  0x12   : > { %p1082_p11 = pnand %p780_p9, %p1269_p1  ;;  %p862_p7 = scmp.lt.s32.totalorder %s853_s7, %s853_s7 }
  0x14   : > { %p844_p12 = pneg %p1082_p11  ;;  %p863_p10 = por %p862_p7, %p861_p5 }
  0x16   : > { %p856_p0 = pnand %p854_p13, %p844_p12 }
  0x18   : > { %p857_p3 = pneg %p856_p0 }
  0x1a   : > { %p864_p9 = pnand %p863_p10, %p857_p3 }
  0x1c   : > { %867 = shalt.err (!%p864_p9)
}
  0x1d   : > { %s994_s8 = smov 256   ;;  %s995_s9 = smov 16  }
  0x1e   : > { %783 = dma.hbm_to_vmem [thread:$0]  (!%p1082_p11), %s1264_s1, 4096, %s176_s28, [#allocation6], %s994_s8, %s994_s8, %s995_s9  }
  0x1f   : > { %s879_s12 = scalar_lea.vmem %s192_s6, 4096  ;;  %p887_p2 = scmp.lt.s32.totalorder %s192_s6, %s192_s6 }
  0x20   : > { %p880_p1 = scmp.ne.s32.totalorder %s192_s6, %s879_s12  ;;  %p888_p6 = scmp.lt.s32.totalorder %s879_s12, %s879_s12 }
  0x22   : > { %p882_p13 = pnand %p880_p1, %p844_p12  ;;  %p889_p5 = por %p888_p6, %p887_p2 }
  0x24   : > { %p883_p0 = pneg %p882_p13 }
  0x26   : > { %p890_p10 = pnand %p889_p5, %p883_p0 }
  0x28   : > { %893 = shalt.err (!%p890_p10)
}
  0x29   : > { %s1270_s13 = smov 128   ;;  %s997_s14 = smov 8  }
  0x2a   : > { %786 = dma.hbm_to_vmem [thread:$0]  (!%p1082_p11), %s1266_s3, 4096, %s192_s6, [#allocation6], %s1270_s13, %s1270_s13, %s997_s14  }
  0x2b   : > { %s1108_s17 = sadd.s32 1, %s990_s21   ;;  %s29_s27 = sadd.s32 1, %s986_s20 }
  0x2c   : > { %s26_s23 = ssub.s32 %s990_s21, %s1108_s17  ;;  %p36_p2 = scmp.ne.s32.totalorder %s986_s20, %s982_s19 }
  0x2d   : > { %p27_p1 = scmp.eq.s32.totalorder %s26_s23, 0  ;;  %p37_p6 = scmp.eq.s32.totalorder %s990_s21, 0 }
  0x2e   : > { %p1278_p3 = scmp.eq.s32.totalorder %s1054_s22, 1  ;;  %p797_p9 = scmp.lt.s32.totalorder %s990_s21, 2 }
  0x2f   : > { %s1117_s28 = scalar_select %p27_p1, %s986_s20, %s29_s27  }
  0x30   : > { %p38_p12 = por %p37_p6, %p36_p2  ;;  %p1121_p7 = por %p1278_p3, %p36_p2 }
  0x31   : > { %s208_s30 = sand.u32 1, %s986_s20   ;;  %s711_s6 = smul.u32 896, %s990_s21 }
  0x32   : > { %s1279_s29 = scalar_select %p1121_p7, 1, 0 }
  0x33   : > { %s766_s7 = smul.u32 56, %s208_s30  ;;  %p1128_p11 = pnand %p797_p9, %p38_p12 }
  0x34   : > { %s1135_s11 = scalar_lea.hbm %s1263_s0, %s711_s6  ;;  %s1139_s16 = scalar_lea.sflag [#allocation3], %s208_s30 }
  0x35   : > { %s212_s12 = scalar_lea.vmem [#allocation2], %s766_s7  ;;  %s894_s23 = scalar_lea.hbm %s1135_s11, 896 }
  0x36   : > { %s219_s15 = sshll.u32 %s212_s12, 4  ;;  %p895_p13 = scmp.ne.s32.totalorder %s1135_s11, %s894_s23  ;;  %s1137_s15 = int_to_ptr.vmem [resolvable:$true] %s219_s15 }
  0x37   : > { %p896_p0 = pneg %p1128_p11  ;;  %s899_s6 = scalar_lea.hbm %s1263_s0, 1792 }
  0x38   : > { %p900_p1 = scmp.lt.s32.totalorder %s1135_s11, %s1263_s0  ;;  %p901_p2 = scmp.lt.s32.totalorder %s899_s6, %s894_s23 }
  0x39   : > { %p897_p5 = pnand %p896_p0, %p895_p13 }
  0x3a   : > { %p902_p6 = por %p901_p2, %p900_p1 }
  0x3b   : > { %p898_p10 = pneg %p897_p5 }
  0x3d   : > { %p903_p12 = pnand %p902_p6, %p898_p10 }
  0x3f   : > { %906 = shalt.err (!%p903_p12)
}
  0x40   : > { %s907_s30 = scalar_lea.vmem %s1137_s15, 896  ;;  %s998_s7 = smov [#allocation2]  }
  0x41   : > { %p908_p3 = scmp.ne.s32.totalorder %s1137_s15, %s907_s30  ;;  %s912_s12 = sshll.u32 %s998_s7, 4  ;;  %s913_s12 = int_to_ptr.vmem [resolvable:$false] %s912_s12 }
  0x42   : > { %s914_s27 = scalar_lea.vmem %s913_s12, 1792  ;;  %p915_p5 = scmp.lt.s32.totalorder %s1137_s15, %s913_s12 }
  0x43   : > { %p910_p9 = pnand %p908_p3, %p896_p0  ;;  %p916_p7 = scmp.lt.s32.totalorder %s914_s27, %s907_s30 }
  0x45   : > { %p911_p13 = pneg %p910_p9  ;;  %p917_p4 = por %p916_p7, %p915_p5 }
  0x47   : > { %p918_p8 = pnand %p917_p4, %p911_p13 }
  0x49   : > { %921 = shalt.err (!%p918_p8)
}
  0x4a   : > { %s1281_s13 = smov 128   ;;  %p1282_p0 = scmp.ne.s32.totalorder %s1276_s26, 0 }
  0x4b   : > { %790 = dma.hbm_to_vmem [thread:$0]  (!%p1128_p11), %s1135_s11, 896, %s1137_s15, %s1139_s16, %s1281_s13, %s1281_s13, %s997_s14  }
  0x4c   : > { %231 = sbr.rel (%p1282_p0) target bundleno = 555 (0x22b), region = 40  ;;  %s1166_s23 = sand.u32 (!%p1282_p0), 1, %s982_s19  }
  0x4d   : > { %s767_s9 = smul.u32 (!%p1282_p0), 56, %s1166_s23  ;;  %s234_s6 = scalar_lea.sflag (!%p1282_p0), [#allocation3], %s1166_s23 }
  0x4e   : > { %p1283_p4 = scmp.ne.s32.totalorder (!%p1282_p0), %s1274_s24, 0 }
  0x4f   : > { %s1172_s8 = scalar_lea.vmem (!%p1282_p0), [#allocation2], %s767_s9 }
  0x51   : > { %965 = dma.done.wait (%p1283_p4), %s234_s6, 896  }
  0x52   : > { %967 = vsyncadd (%p1283_p4), %s234_s6, 4294966400  ;;  %p1284_p8 = scmp.eq.s32.totalorder %s1054_s22, 0 }
  0x54   : > { %969 = dma.done.wait (%p1284_p8), [#allocation6], 8192   ;;  %p1285_p7 = pmov %p1284_p8 }
  0x55   : > { %v999_v0 = vmov 0.0   ;;  %v312_v1 = vld [vmem:[#allocation5 + $0xf8] sm:$0xff]  ;;  %v311_v2 = vld [vmem:[#allocation5 + $0xf0] sm:$0xff]  ;;  %v310_v3 = vld [vmem:[#allocation5 + $0xe8] sm:$0xff]  ;;  %s1204_s15 = scalar_lea.vmem [#allocation8], %s767_s9  ;;  %s712_s10 = smul.u32 896, %s1054_s22 }
  0x56   : > { %971 = vsyncadd (%p1285_p7), [#allocation6], 4294959104  ;;  %389 = vmatprep.mubr.f32.mxu0 %v999_v0  ;;  %325 = vmatprep.subr.mxu0 %v312_v1  ;;  %v309_v4 = vld [vmem:[#allocation5 + $0xe0] sm:$0xff]  ;;  %v308_v5 = vld [vmem:[#allocation5 + $0xd8] sm:$0xff]  ;;  %s606_s16 = sshll.u32 %s1204_s15, 4  ;;  %s593_s27 = scalar_lea.sflag [#allocation4], %s1166_s23  ;;  %s1213_s16 = int_to_ptr.vmem [resolvable:$true] %s606_s16 }
  0x57   : > { %326 = vmatpush1.msra.mxu0 %v311_v2  ;;  %v307_v6 = vld [vmem:[#allocation5 + $0xd0] sm:$0xff]  ;;  %v306_v7 = vld [vmem:[#allocation5 + $0xc8] sm:$0xff]  ;;  %v305_v8 = vld [vmem:[#allocation5 + $0xc0] sm:$0xff]  ;;  %s1219_s12 = scalar_lea.hbm %s1268_s5, %s712_s10  ;;  %s922_s13 = scalar_lea.vmem %s1213_s16, 896 }
  0x58   : > { %327 = vmatprep.subr.mxu0 %v310_v3  ;;  %v304_v9 = vld [vmem:[#allocation5 + $0xb8] sm:$0xff]  ;;  %v303_v10 = vld [vmem:[#allocation5 + $0xb0] sm:$0xff]  ;;  %v302_v11 = vld [vmem:[#allocation5 + $0xa8] sm:$0xff]  ;;  %p923_p11 = scmp.ne.s32.totalorder %s1213_s16, %s922_s13  ;;  %p1286_p10 = scmp.ne.s32.totalorder %s1279_s29, 0 }
  0x59   : > { %328 = vmatpush1.msra.mxu0 %v309_v4  ;;  %v301_v12 = vld [vmem:[#allocation5 + $0xa0] sm:$0xff]  ;;  %v300_v13 = vld [vmem:[#allocation5 + $0x98] sm:$0xff]  ;;  %v299_v14 = vld [vmem:[#allocation5 + $0x90] sm:$0xff]  ;;  %s1000_s22 = smov [#allocation8]  }
  0x5a   : > { %329 = vmatprep.subr.mxu0 %v308_v5  ;;  %v298_v15 = vld [vmem:[#allocation5 + $0x88] sm:$0xff]  ;;  %v297_v16 = vld [vmem:[#allocation5 + $0x80] sm:$0xff]  ;;  %v477_v17 = vld [vmem:[#allocation7 + $0xf8] sm:$0xff]  ;;  %p924_p1 = pnand %p923_p11, %p1286_p10  ;;  %s926_s9 = sshll.u32 %s1000_s22, 4  ;;  %s927_s9 = int_to_ptr.vmem [resolvable:$false] %s926_s9 }
  0x5b   : > { %330 = vmatpush1.msra.mxu0 %v307_v6  ;;  %v461_v18 = vld [vmem:[#allocation7 + $0x78] sm:$0xff]  ;;  %v476_v19 = vld [vmem:[#allocation7 + $0xf0] sm:$0xff]  ;;  %713 = vmatprep.subr.mxu1 %v477_v17  ;;  %v475_v23 = vld [vmem:[#allocation7 + $0xe8] sm:$0xff]  ;;  %s928_s6 = scalar_lea.vmem %s927_s9, 1792  ;;  %p929_p6 = scmp.lt.s32.totalorder %s1213_s16, %s927_s9 }
  0x5c   : > { %331 = vmatprep.subr.mxu0 %v306_v7  ;;  %v296_v20 = vld [vmem:[#allocation5 + $0x78] sm:$0xff]  ;;  %v460_v21 = vld [vmem:[#allocation7 + $0x70] sm:$0xff]  ;;  %714 = vmatpush3.msra.mxu1 %v461_v18  ;;  %v294_v24 = vld [vmem:[#allocation5 + $0x68] sm:$0xff]  ;;  %p925_p2 = pneg %p924_p1  ;;  %p930_p12 = scmp.lt.s32.totalorder %s928_s6, %s922_s13 }
  0x5d   : > { %332 = vmatpush1.msra.mxu0 %v305_v8  ;;  %v295_v22 = vld [vmem:[#allocation5 + $0x70] sm:$0xff]  ;;  %715 = vmatprep.subr.mxu1 %v476_v19  ;;  %v459_v25 = vld [vmem:[#allocation7 + $0x68] sm:$0xff]  ;;  %v293_v26 = vld [vmem:[#allocation5 + $0x60] sm:$0xff] }
  0x5e   : > { %333 = vmatprep.subr.mxu0 %v304_v9  ;;  %716 = vmatpush3.msra.mxu1 %v460_v21  ;;  %v474_v27 = vld [vmem:[#allocation7 + $0xe0] sm:$0xff]  ;;  %v292_v28 = vld [vmem:[#allocation5 + $0x58] sm:$0xff]  ;;  %v291_v30 = vld [vmem:[#allocation5 + $0x50] sm:$0xff]  ;;  %v315_v9 = vlaneseq  ;;  %p931_p3 = por %p930_p12, %p929_p6 }
  0x5f   : > { %334 = vmatpush1.msra.mxu0 %v303_v10  ;;  %717 = vmatprep.subr.mxu1 %v475_v23  ;;  %v458_v29 = vld [vmem:[#allocation7 + $0x60] sm:$0xff]  ;;  %v473_v31 = vld [vmem:[#allocation7 + $0xd8] sm:$0xff]  ;;  %v290_v32 = vld [vmem:[#allocation5 + $0x48] sm:$0xff] }
  0x60   : > { %335 = vmatprep.subr.mxu0 %v302_v11  ;;  %718 = vmatpush3.msra.mxu1 %v459_v25  ;;  %v457_v33 = vld [vmem:[#allocation7 + $0x58] sm:$0xff]  ;;  %v289_v34 = vld [vmem:[#allocation5 + $0x40] sm:$0xff]  ;;  %v472_v35 = vld [vmem:[#allocation7 + $0xd0] sm:$0xff]  ;;  %p932_p9 = pnand %p931_p3, %p925_p2 }
  0x61   : > { %336 = vmatpush1.msra.mxu0 %v301_v12  ;;  %719 = vmatprep.subr.mxu1 %v474_v27  ;;  %v288_v36 = vld [vmem:[#allocation5 + $0x38] sm:$0xff]  ;;  %v456_v37 = vld [vmem:[#allocation7 + $0x50] sm:$0xff]  ;;  %v471_v39 = vld [vmem:[#allocation7 + $0xc8] sm:$0xff] }
  0x62   : > { %337 = vmatprep.subr.mxu0 %v300_v13  ;;  %720 = vmatpush3.msra.mxu1 %v458_v29  ;;  %v287_v38 = vld [vmem:[#allocation5 + $0x30] sm:$0xff]  ;;  %v286_v40 = vld [vmem:[#allocation5 + $0x28] sm:$0xff]  ;;  %v285_v42 = vld [vmem:[#allocation5 + $0x20] sm:$0xff] }
  0x63   : > { %338 = vmatpush1.msra.mxu0 %v299_v14  ;;  %721 = vmatprep.subr.mxu1 %v473_v31  ;;  %v455_v41 = vld [vmem:[#allocation7 + $0x48] sm:$0xff]  ;;  %v470_v43 = vld [vmem:[#allocation7 + $0xc0] sm:$0xff]  ;;  %v284_v44 = vld [vmem:[#allocation5 + $0x18] sm:$0xff] }
  0x64   : > { %339 = vmatprep.subr.mxu0 %v298_v15  ;;  %722 = vmatpush3.msra.mxu1 %v457_v33  ;;  %v454_v45 = vld [vmem:[#allocation7 + $0x40] sm:$0xff]  ;;  %v283_v46 = vld [vmem:[#allocation5 + $0x10] sm:$0xff]  ;;  %v469_v47 = vld [vmem:[#allocation7 + $0xb8] sm:$0xff] }
  0x65   : > { %340 = vmatpush1.msra.mxu0 %v297_v16  ;;  %723 = vmatprep.subr.mxu1 %v472_v35  ;;  %v282_v48 = vld [vmem:[#allocation5 + $0x8] sm:$0xff]  ;;  %v453_v49 = vld [vmem:[#allocation7 + $0x38] sm:$0xff]  ;;  %v281_v50 = vld [vmem:[#allocation5] sm:$0xff] }
  0x66   : > { %341 = vmatprep.subr.mxu0 %v296_v20  ;;  %724 = vmatpush3.msra.mxu1 %v456_v37  ;;  %v468_v51 = vld [vmem:[#allocation7 + $0xb0] sm:$0xff]  ;;  %v467_v54 = vld [vmem:[#allocation7 + $0xa8] sm:$0xff]  ;;  %v466_v56 = vld [vmem:[#allocation7 + $0xa0] sm:$0xff] }
  0x67   : > { %342 = vmatpush1.msra.mxu0 %v295_v22  ;;  %725 = vmatprep.subr.mxu1 %v471_v39  ;;  %v274_v52 = vld [vmem:[%s1172_s8] sm:$0xff]  ;;  %v275_v57 = vld [vmem:[%s1172_s8 + $0x8] sm:$0xff]  ;;  %v450_v58 = vld [vmem:[#allocation7 + $0x20] sm:$0xff] }
  0x68   : > { %343 = vmatprep.subr.mxu0 %v294_v24  ;;  %726 = vmatpush3.msra.mxu1 %v455_v41  ;;  %v452_v53 = vld [vmem:[#allocation7 + $0x30] sm:$0xff]  ;;  %v451_v55 = vld [vmem:[#allocation7 + $0x28] sm:$0xff]  ;;  %v276_v59 = vld [vmem:[%s1172_s8 + $0x10] sm:$0xff] }
  0x69   : > { %344 = vmatpush1.msra.mxu0 %v293_v26  ;;  %727 = vmatprep.subr.mxu1 %v470_v43  ;;  %v277_v60 = vld [vmem:[%s1172_s8 + $0x18] sm:$0xff]  ;;  %v278_v61 = vld [vmem:[%s1172_s8 + $0x20] sm:$0xff]  ;;  %v279_v62 = vld [vmem:[%s1172_s8 + $0x28] sm:$0xff] }
  0x6a   : > { %345 = vmatprep.subr.mxu0 %v292_v28  ;;  %728 = vmatpush3.msra.mxu1 %v454_v45  ;;  %v280_v63 = vld [vmem:[%s1172_s8 + $0x30] sm:$0xff]  ;;  %v464_v3 = vld [vmem:[#allocation7 + $0x90] sm:$0xff]  ;;  %v463_v5 = vld [vmem:[#allocation7 + $0x88] sm:$0xff] }
  0x6b   : > { %346 = vmatpush1.msra.mxu0 %v291_v30  ;;  %729 = vmatprep.subr.mxu1 %v469_v47  ;;  %v465_v1 = vld [vmem:[#allocation7 + $0x98] sm:$0xff]  ;;  %v448_v4 = vld [vmem:[#allocation7 + $0x10] sm:$0xff]  ;;  %v447_v6 = vld [vmem:[#allocation7 + $0x8] sm:$0xff] }
  0x6c   : > { %347 = vmatprep.subr.mxu0 %v290_v32  ;;  %730 = vmatpush3.msra.mxu1 %v453_v49  ;;  %v449_v2 = vld [vmem:[#allocation7 + $0x18] sm:$0xff]  ;;  %v462_v7 = vld [vmem:[#allocation7 + $0x80] sm:$0xff]  ;;  %v313_v11 = vld [vmem:[%s1265_s2] sm:$0x3] }
  0x6d   : > { %348 = vmatpush1.msra.mxu0 %v289_v34  ;;  %731 = vmatprep.subr.mxu1 %v468_v51  ;;  %v446_v8 = vld [vmem:[#allocation7] sm:$0xff] }
  0x6e   : > { %349 = vmatprep.subr.mxu0 %v288_v36  ;;  %732 = vmatpush3.msra.mxu1 %v452_v53 }
  0x6f   : > { %350 = vmatpush1.msra.mxu0 %v287_v38  ;;  %733 = vmatprep.subr.mxu1 %v467_v54 }
  0x70   : > { %351 = vmatprep.subr.mxu0 %v286_v40  ;;  %734 = vmatpush3.msra.mxu1 %v451_v55 }
  0x71   : > { %352 = vmatpush1.msra.mxu0 %v285_v42  ;;  %735 = vmatprep.subr.mxu1 %v466_v56 }
  0x72   : > { %353 = vmatprep.subr.mxu0 %v284_v44  ;;  %736 = vmatpush3.msra.mxu1 %v450_v58  ;;  %v707_v58 = vld [vmem:[%s1267_s4] ss:$0 sm:$0xff] }
  0x73   : > { %354 = vmatpush1.msra.mxu0 %v283_v46  ;;  %737 = vmatprep.subr.mxu1 %v465_v1 }
  0x74   : > { %355 = vmatprep.subr.mxu0 %v282_v48  ;;  %738 = vmatpush3.msra.mxu1 %v449_v2 }
  0x75   : > { %356 = vmatpush1.msra.mxu0 %v281_v50  ;;  %739 = vmatprep.subr.mxu1 %v464_v3 }
  0x76   : > { %390 = vmatmul.mubr.f32.vlgmr.msra.gmra.mxu0 %v274_v52  ;;  %740 = vmatpush3.msra.mxu1 %v448_v4 }
  0x77   : > { %395 = vmatprep.mubr.f32.mxu0 %v999_v0  ;;  %741 = vmatprep.subr.mxu1 %v463_v5 }
  0x78   : > { %742 = vmatpush3.msra.mxu1 %v447_v6 }
  0x79   : > { %743 = vmatprep.subr.mxu1 %v462_v7 }
  0x7a   : > { %396 = vmatmul.mubr.f32.gmra.mxu0 %v275_v57  ;;  %744 = vmatpush3.msra.mxu1 %v446_v8 }
  0x7b   : > { %401 = vmatprep.mubr.f32.mxu0 %v999_v0 }
  0x7e   : > { %402 = vmatmul.mubr.f32.gmra.mxu0 %v276_v59 }
  0x7f   : > { %407 = vmatprep.mubr.f32.mxu0 %v999_v0 }
  0x82   : > { %408 = vmatmul.mubr.f32.gmra.mxu0 %v277_v60 }
  0x83   : > { %413 = vmatprep.mubr.f32.mxu0 %v999_v0 }
  0x86   : > { %414 = vmatmul.mubr.f32.gmra.mxu0 %v278_v61 }
  0x87   : > { %419 = vmatprep.mubr.f32.mxu0 %v999_v0 }
  0x8a   : > { %420 = vmatmul.mubr.f32.gmra.mxu0 %v279_v62 }
  0x8b   : > { %425 = vmatprep.mubr.f32.mxu0 %v999_v0  ;;  %v316_v0 = vshrl.u32 %v315_v9, 7 }
  0x8d   : > { %v317_v10 = vsub.s32 0, %v316_v0  ;;  %v321_v12 = vsub.s32 1, %v316_v0 }
  0x8e   : > { %426 = vmatmul.mubr.f32.gmra.mxu0 %v280_v63 }
  0x8f   : > { %v318_v13 = vrot.slane %v313_v11, %v317_v10  ;;  %v322_v14 = vrot.slane %v313_v11, %v321_v12 }
 0x136   : > { %v391_v15 = vpop.f32.mrf.mxu0 }
 0x137   : > { %v392_v16 = vadd.f32 %v391_v15, %v318_v13 }
 0x138   : > { %v393_v17 = vpop.f32.mrf.mxu0 }
 0x139   : > { %v394_v18 = vadd.f32 %v393_v17, %v322_v14  ;;  %v432_v21 = vmax.f32 %v392_v16, 0.0 }
 0x13a   : > { %v397_v19 = vpop.f32.mrf.mxu0 }
 0x13b   : > { %v433_v20 = vmax.f32 %v394_v18, 0.0  ;;  %v398_v22 = vadd.f32 %v397_v19, %v318_v13 }
 0x13c   : > { %v399_v23 = vpop.f32.mrf.mxu0 }
 0x13d   : > { %v400_v24 = vadd.f32 %v399_v23, %v322_v14  ;;  %549 = vmatprep.mubr.f32.mxu1 %v433_v20  ;;  %v434_v27 = vmax.f32 %v398_v22, 0.0 }
 0x13e   : > { %v403_v25 = vpop.f32.mrf.mxu0  ;;  %550 = vmatmul.mubr.f32.vlgmr.msra.gmra.mxu1 %v432_v21 }
 0x13f   : > { %v435_v26 = vmax.f32 %v400_v24, 0.0  ;;  %v404_v28 = vadd.f32 %v403_v25, %v318_v13 }
 0x140   : > { %v405_v29 = vpop.f32.mrf.mxu0 }
 0x141   : > { %v406_v30 = vadd.f32 %v405_v29, %v322_v14  ;;  %554 = vmatprep.mubr.f32.mxu1 %v435_v26  ;;  %v436_v33 = vmax.f32 %v404_v28, 0.0 }
 0x142   : > { %v409_v31 = vpop.f32.mrf.mxu0  ;;  %555 = vmatmul.mubr.f32.gmra.mxu1 %v434_v27 }
 0x143   : > { %v437_v32 = vmax.f32 %v406_v30, 0.0  ;;  %v410_v34 = vadd.f32 %v409_v31, %v318_v13 }
 0x144   : > { %v411_v35 = vpop.f32.mrf.mxu0 }
 0x145   : > { %v412_v36 = vadd.f32 %v411_v35, %v322_v14  ;;  %559 = vmatprep.mubr.f32.mxu1 %v437_v32  ;;  %v438_v39 = vmax.f32 %v410_v34, 0.0 }
 0x146   : > { %v415_v37 = vpop.f32.mrf.mxu0  ;;  %560 = vmatmul.mubr.f32.gmra.mxu1 %v436_v33 }
 0x147   : > { %v439_v38 = vmax.f32 %v412_v36, 0.0  ;;  %v416_v40 = vadd.f32 %v415_v37, %v318_v13 }
 0x148   : > { %v417_v41 = vpop.f32.mrf.mxu0 }
 0x149   : > { %v418_v42 = vadd.f32 %v417_v41, %v322_v14  ;;  %564 = vmatprep.mubr.f32.mxu1 %v439_v38  ;;  %v440_v45 = vmax.f32 %v416_v40, 0.0 }
 0x14a   : > { %v421_v43 = vpop.f32.mrf.mxu0  ;;  %565 = vmatmul.mubr.f32.gmra.mxu1 %v438_v39 }
 0x14b   : > { %v441_v44 = vmax.f32 %v418_v42, 0.0  ;;  %v422_v46 = vadd.f32 %v421_v43, %v318_v13 }
 0x14c   : > { %v423_v47 = vpop.f32.mrf.mxu0 }
 0x14d   : > { %v424_v48 = vadd.f32 %v423_v47, %v322_v14  ;;  %569 = vmatprep.mubr.f32.mxu1 %v441_v44  ;;  %v442_v51 = vmax.f32 %v422_v46, 0.0 }
 0x14e   : > { %v427_v49 = vpop.f32.mrf.mxu0  ;;  %570 = vmatmul.mubr.f32.gmra.mxu1 %v440_v45 }
 0x14f   : > { %v443_v50 = vmax.f32 %v424_v48, 0.0  ;;  %v428_v52 = vadd.f32 %v427_v49, %v318_v13 }
 0x150   : > { %v429_v53 = vpop.f32.mrf.mxu0 }
 0x151   : > { %v430_v54 = vadd.f32 %v429_v53, %v322_v14  ;;  %574 = vmatprep.mubr.f32.mxu1 %v443_v50  ;;  %v444_v56 = vmax.f32 %v428_v52, 0.0 }
 0x152   : > { %575 = vmatmul.mubr.f32.gmra.mxu1 %v442_v51 }
 0x153   : > { %v445_v55 = vmax.f32 %v430_v54, 0.0 }
 0x155   : > { %579 = vmatprep.mubr.f32.mxu1 %v445_v55 }
 0x156   : > { %580 = vmatmul.mubr.f32.gmra.mxu1 %v444_v56 }
 0x1fe   : > { %v745_v57 = vpop.f32.mrf.mxu1 }
 0x200   : > { %v746_v59 = vpop.f32.mrf.mxu1 }
 0x201   : > { %v747_v60 = vadd.f32 %v746_v59, %v745_v57 }
 0x202   : > { %v748_v61 = vpop.f32.mrf.mxu1 }
 0x203   : > { %v552_v62 = vadd.f32 %v747_v60, %v707_v58 }
 0x204   : > { %v749_v63 = vpop.f32.mrf.mxu1 }
 0x205   : > { %585 = vst [vmem:[%s1204_s15] sm:$0xff] %v552_v62  ;;  %v750_v1 = vadd.f32 %v749_v63, %v748_v61 }
 0x206   : > { %v751_v2 = vpop.f32.mrf.mxu1 }
 0x207   : > { %v557_v3 = vadd.f32 %v750_v1, %v707_v58 }
 0x208   : > { %v752_v4 = vpop.f32.mrf.mxu1 }
 0x209   : > { %586 = vst [vmem:[%s1204_s15 + $0x8] sm:$0xff] %v557_v3  ;;  %v753_v5 = vadd.f32 %v752_v4, %v751_v2 }
 0x20a   : > { %v754_v6 = vpop.f32.mrf.mxu1 }
 0x20b   : > { %v562_v7 = vadd.f32 %v753_v5, %v707_v58 }
 0x20c   : > { %v755_v8 = vpop.f32.mrf.mxu1 }
 0x20d   : > { %587 = vst [vmem:[%s1204_s15 + $0x10] sm:$0xff] %v562_v7  ;;  %v756_v9 = vadd.f32 %v755_v8, %v754_v6 }
 0x20e   : > { %v757_v0 = vpop.f32.mrf.mxu1 }
 0x20f   : > { %v567_v10 = vadd.f32 %v756_v9, %v707_v58 }
 0x210   : > { %v758_v11 = vpop.f32.mrf.mxu1 }
 0x211   : > { %588 = vst [vmem:[%s1204_s15 + $0x18] sm:$0xff] %v567_v10  ;;  %v759_v12 = vadd.f32 %v758_v11, %v757_v0 }
 0x212   : > { %v760_v13 = vpop.f32.mrf.mxu1 }
 0x213   : > { %v572_v14 = vadd.f32 %v759_v12, %v707_v58 }
 0x214   : > { %v761_v15 = vpop.f32.mrf.mxu1 }
 0x215   : > { %589 = vst [vmem:[%s1204_s15 + $0x20] sm:$0xff] %v572_v14  ;;  %v762_v16 = vadd.f32 %v761_v15, %v760_v13 }
 0x216   : > { %v763_v17 = vpop.f32.mrf.mxu1 }
 0x217   : > { %v577_v18 = vadd.f32 %v762_v16, %v707_v58 }
 0x218   : > { %v764_v19 = vpop.f32.mrf.mxu1 }
 0x219   : > { %590 = vst [vmem:[%s1204_s15 + $0x28] sm:$0xff] %v577_v18  ;;  %v765_v20 = vadd.f32 %v764_v19, %v763_v17 }
 0x21b   : > { %v582_v21 = vadd.f32 %v765_v20, %v707_v58 }
 0x21d   : > { %591 = vst [vmem:[%s1204_s15 + $0x30] sm:$0xff] %v582_v21 }
 0x21e   : > { %935 = shalt.err (!%p932_p9)
}
 0x21f   : > { %s936_s8 = scalar_lea.hbm %s1219_s12, 896  ;;  %s940_s14 = scalar_lea.hbm %s1268_s5, 1792 }
 0x220   : > { %p937_p13 = scmp.ne.s32.totalorder %s1219_s12, %s936_s8  ;;  %p941_p4 = scmp.lt.s32.totalorder %s1219_s12, %s1268_s5 }
 0x221   : > { %p942_p8 = scmp.lt.s32.totalorder %s940_s14, %s936_s8 }
 0x222   : > { %p938_p5 = pnand %p937_p13, %p1286_p10 }
 0x223   : > { %p943_p7 = por %p942_p8, %p941_p4 }
 0x224   : > { %p939_p0 = pneg %p938_p5 }
 0x226   : > { %p944_p11 = pnand %p943_p7, %p939_p0 }
 0x228   : > { %947 = shalt.err (!%p944_p11)
}
 0x229   : > { %s1001_s10 = smov 128   ;;  %s1002_s30 = smov 8  }
 0x22a   : > { %778 = dma.vmem_to_hbm [thread:$0]  (%p1286_p10), %s1213_s16, 896, %s1219_s12, %s593_s27, %s1001_s10, %s1001_s10, %s1002_s30  }
 0x22b PF: > { %s621_s7 = sand.u32 1, %s978_s18   ;;  %p1287_p1 = scmp.ne.s32.totalorder %s1275_s25, 0 }
 0x22c   : > { %p1288_p2 = scmp.ge.s32.totalorder %s990_s21, 2  ;;  %s622_s13 = scalar_lea.sflag [#allocation4], %s621_s7 }
 0x22e   : > { %p792_p6 = pnand %p1288_p2, %p1287_p1 }
 0x230   : > { %p793_p12 = pneg %p792_p6 }
 0x232   : > { %973 = dma.done.wait (%p793_p12), %s622_s13, 896  }
 0x233   : > { %975 = vsyncadd (%p793_p12), %s622_s13, 4294966400  ;;  %p19_p3 = scmp.ge.s32.totalorder %s1108_s17, 4   ;;  %s1289_s18 = smov %s982_s19 }
 0x234   : > { %s1290_s19 = smov %s986_s20  ;;  %s1291_s20 = smov %s1117_s28 }
 0x235   : > { %s1292_s21 = smov %s1108_s17  ;;  %21 = sbr.rel (!%p19_p3) target bundleno = 6 (0x6), region = 93 }
 0x23a   :  { %627 = vsyncpa [#allocation3], 1 }
 0x23b   :  { %629 = vsyncpa [#allocation3 + $0x1], 1 }
 0x23c   :  { %630 = vsyncpa [#allocation6], 1 }
 0x23d   :  { %631 = vsyncpa [#allocation4], 1 }
 0x23e   :  { %633 = vsyncpa [#allocation4 + $0x1], 1 }

</bundles_post_ra>
